<compile_context>
chip_gen: v6e
topology: v6e:2x2x1
jax: 0.10.0
libtpu: 0.0.40
codegen_flags: <defaults>
</compile_context>

<pallas_src>
import jax
import jax.numpy as jnp
from jax.experimental import pallas as pl
from jax.experimental.pallas import tpu as pltpu


def _mbd_kernel(xj_ref, xi_ref, t_ref, sel_ref, o_ref, acc_ref):
    """One (j_tile, i_tile) step of the symmetric pairwise similarity.

    xj_ref : (tile, A)    rows of x for the output tile j
    xi_ref : (tile, A)    rows of x being reduced over (tile i)
    t_ref  : (A, B*C)     flattened projection tensor (resident, fetched once)
    sel_ref: (B*C, B)     block-diagonal 0/1 selector (C-reduction on the MXU)
    o_ref  : (tile, A+B)  fused [x | similarity] output tile (resident across i)
    acc_ref: (N, B)       f32 accumulator for ALL rows, resident across the whole grid
    """
    j = pl.program_id(0)
    i = pl.program_id(1)
    ni = pl.num_programs(1)

    tile, n_in = xj_ref.shape
    bc, n_out = sel_ref.shape

    # Zero the whole-batch accumulator once, at the very first grid step.
    @pl.when((j == 0) & (i == 0))
    def _init():
        acc_ref[...] = jnp.zeros_like(acc_ref)

    # d is symmetric: only upper-triangular tile pairs do compute.
    @pl.when(i >= j)
    def _compute():
        t_flat = t_ref[...]
        # Tiny per-tile projections on the MXU (fused former "stage 1").
        mj = jnp.dot(xj_ref[...], t_flat, preferred_element_type=jnp.float32)
        mi = jnp.dot(xi_ref[...], t_flat, preferred_element_type=jnp.float32)

        # Lane-dense pairwise |diff| over the full B*C slab (VPU).
        diff = jnp.abs(mj[:, None, :] - mi[None, :, :])            # (tile, tile, BC)

        # C-reduction on the MXU via the block-diagonal 0/1 selector.
        d = jnp.dot(diff.reshape(tile * tile, bc), sel_ref[...],
                    preferred_element_type=jnp.float32)             # (tile*tile, B)

        # exp on the EUP, then reduce over the i rows / j rows of this tile pair.
        e = jnp.exp(-d).reshape(tile, tile, n_out)                   # (tile, tile, B)

        j_rows = pl.multiple_of(j * tile, tile)
        acc_ref[pl.ds(j_rows, tile), :] += jnp.sum(e, axis=1)        # contributions to tile j

        @pl.when(i > j)
        def _mirror():
            # Off-diagonal only (avoid double counting the diagonal tile).
            i_rows = pl.multiple_of(i * tile, tile)
            acc_ref[pl.ds(i_rows, tile), :] += jnp.sum(e, axis=0)    # mirrored contributions

    # All contributions to tile j are in by the end of grid row j: finalize once.
    @pl.when(i == ni - 1)
    def _finalize():
        j_rows = pl.multiple_of(j * tile, tile)
        o_ref[:, :n_in] = xj_ref[...].astype(o_ref.dtype)
        o_ref[:, n_in:] = (acc_ref[pl.ds(j_rows, tile), :] - 1.0).astype(o_ref.dtype)


def _choose_tile(n, cap=128):
    """Largest multiple-of-8 divisor of n that is <= cap (or n itself)."""
    if n <= cap:
        return n
    for t in range(cap - cap % 8, 7, -8):
        if n % t == 0:
            return t
    # TODO(synk): pad N up to a tile multiple instead of one full-extent tile.
    return n


def minibatch_discrimination(x, T, *, tile_cap=128):
    """x: (N, A) f32, T: (A, B, C) f32  ->  (N, A + B) f32."""
    N, A = x.shape
    A2, B, C = T.shape
    assert A == A2, "x feature dim must match T's first dim"
    BC = B * C
    t_flat = T.reshape(A, BC)

    tile = _choose_tile(N, tile_cap)
    n_tiles = N // tile
    assert n_tiles * tile == N

    # Block-diagonal 0/1 selector: the (BC, B) matmul performs the per-feature C-sum
    # on the MXU instead of a strided 16-wide XLU reduction.
    sel = (jnp.arange(BC)[:, None] // C == jnp.arange(B)[None, :]).astype(jnp.float32)

    cost = pl.CostEstimate(
        flops=int(N * N * BC * (2 * B + 2) + 4 * N * N * A * BC // tile),
        transcendentals=int(N * N * B),
        bytes_accessed=int(4 * (2 * N * N * A // tile + A * BC + BC * B + N * (A + B))),
    )

    return pl.pallas_call(
        _mbd_kernel,
        out_shape=jax.ShapeDtypeStruct((N, A + B), x.dtype),
        grid_spec=pltpu.PrefetchScalarGridSpec(
            num_scalar_prefetch=0,
            grid=(n_tiles, n_tiles),
            in_specs=[
                pl.BlockSpec((tile, A), lambda j, i: (j, 0)),   # x rows of output tile j
                pl.BlockSpec((tile, A), lambda j, i: (i, 0)),   # x rows reduced over (tile i)
                pl.BlockSpec((A, BC), lambda j, i: (0, 0)),     # T_flat (resident)
                pl.BlockSpec((BC, B), lambda j, i: (0, 0)),     # selector (resident)
            ],
            out_specs=pl.BlockSpec((tile, A + B), lambda j, i: (j, 0)),
            scratch_shapes=[pltpu.VMEM((N, B), jnp.float32)],   # whole-batch accumulator
        ),
        compiler_params=pltpu.CompilerParams(
            # The shared accumulator requires sequential grid execution; the 2x win
            # from the i>=j symmetry skip replaces megacore sharding.
            dimension_semantics=("arbitrary", "arbitrary"),
            vmem_limit_bytes=32 * 1024 * 1024),
        cost_estimate=cost,
    )(x, x, t_flat, sel)


def _reference(x, T):
    """Pure-JAX reference mirroring the PyTorch forward exactly."""
    A, B, C = T.shape
    M = jnp.dot(x, T.reshape(A, B * C),
                precision=jax.lax.Precision.HIGHEST).reshape(-1, B, C)   # (N, B, C)
    M1 = M[None, :, :, :]                                                # (1, N, B, C)
    M2 = M[:, None, :, :]                                                # (N, 1, B, C)
    out = jnp.sum(jnp.exp(-jnp.abs(M1 - M2).sum(3)), axis=0) - 1.0
    return jnp.concatenate([x, out], axis=1)


if __name__ == "__main__":
    key = jax.random.PRNGKey(0)
    kx, kt, kx2, kt2 = jax.random.split(key, 4)

    # ---- Test 1: module-default shapes (single-tile / diagonal-only path) ----
    batch, input_features, output_features, hidden_features = 8, 32, 8, 16
    x = jax.random.normal(kx, (batch, input_features), dtype=jnp.float32)
    T = jax.random.normal(
        kt, (input_features, output_features, hidden_features), dtype=jnp.float32)

    out = jax.block_until_ready(minibatch_discrimination(x, T))
    ref = jax.block_until_ready(_reference(x, T))
    assert out.shape == (batch, input_features + output_features)
    assert jnp.allclose(out, ref, atol=1e-4, rtol=1e-4), "mismatch (single tile)"

    # ---- Test 2: multi-tile path (exercises the symmetric accumulation) ------
    n2, a2, b2, c2 = 384, 24, 4, 16
    x2 = 0.05 * jax.random.normal(kx2, (n2, a2), dtype=jnp.float32)
    T2 = 0.1 * jax.random.normal(kt2, (a2, b2, c2), dtype=jnp.float32)

    out2 = jax.block_until_ready(minibatch_discrimination(x2, T2))
    ref2 = jax.block_until_ready(_reference(x2, T2))
    assert out2.shape == (n2, a2 + b2)
    assert jnp.allclose(out2, ref2, atol=1e-1, rtol=1e-4), "mismatch (multi tile)"

    print("KERNEL_OK")
</pallas_src>

<mosaic_0001>
module attributes {stable_mosaic.version = 11 : i64} {
  func.func @_mbd_kernel(%arg0: i32, %arg1: i32, %arg2: memref<8x32xf32, #tpu.memory_space<vmem>>, %arg3: memref<8x32xf32, #tpu.memory_space<vmem>>, %arg4: memref<32x128xf32, #tpu.memory_space<vmem>>, %arg5: memref<128x8xf32, #tpu.memory_space<vmem>>, %arg6: memref<8x40xf32, #tpu.memory_space<vmem>>, %arg7: memref<8x8xf32, #tpu.memory_space<vmem>>) attributes {dimension_semantics = [#tpu.dimension_semantics<arbitrary>, #tpu.dimension_semantics<arbitrary>], iteration_bounds = array<i64: 1, 1>, scalar_prefetch = 0 : i64, scratch_operands = 1 : i64, tpu.core_type = #tpu.core_type<tc>, window_params = [{transform_indices = @transform_0, window_bounds = array<i64: 8, 32>}, {transform_indices = @transform_1, window_bounds = array<i64: 8, 32>}, {pipeline_mode = #tpu.pipeline_mode<synchronous>, transform_indices = @transform_2, window_bounds = array<i64: 32, 128>}, {pipeline_mode = #tpu.pipeline_mode<synchronous>, transform_indices = @transform_3, window_bounds = array<i64: 128, 8>}, {transform_indices = @transform_4, window_bounds = array<i64: 8, 40>}]} {
    %c0_i32 = arith.constant 0 : i32
    %0 = arith.cmpi eq, %arg0, %c0_i32 : i32
    %c0_i32_0 = arith.constant 0 : i32
    %1 = arith.cmpi eq, %arg1, %c0_i32_0 : i32
    %2 = arith.andi %0, %1 : i1
    %3 = arith.extui %2 : i1 to i32
    %c0_i32_1 = arith.constant 0 : i32
    %4 = arith.cmpi ne, %3, %c0_i32_1 : i32
    scf.if %4 {
      %cst = arith.constant 0.000000e+00 : f32
      %11 = vector.broadcast %cst : f32 to vector<8x8xf32>
      %c0 = arith.constant 0 : index
      %c0_5 = arith.constant 0 : index
      %12 = vector.load %arg7[%c0, %c0_5] : memref<8x8xf32, #tpu.memory_space<vmem>>, vector<8x8xf32>
      tpu.vector_store %arg7[%c0, %c0_5], %11 {strides = array<i32>} : memref<8x8xf32, #tpu.memory_space<vmem>>, vector<8x8xf32>,
    } else {
    }
    %5 = arith.cmpi sge, %arg1, %arg0 : i32
    %6 = arith.extui %5 : i1 to i32
    %c0_i32_2 = arith.constant 0 : i32
    %7 = arith.cmpi ne, %6, %c0_i32_2 : i32
    scf.if %7 {
      %c0 = arith.constant 0 : index
      %c0_5 = arith.constant 0 : index
      %11 = vector.load %arg4[%c0, %c0_5] : memref<32x128xf32, #tpu.memory_space<vmem>>, vector<32x128xf32>
      %c0_6 = arith.constant 0 : index
      %c0_7 = arith.constant 0 : index
      %12 = vector.load %arg2[%c0_6, %c0_7] : memref<8x32xf32, #tpu.memory_space<vmem>>, vector<8x32xf32>
      %cst = arith.constant dense<0.000000e+00> : vector<8x128xf32>
      %13 = tpu.matmul %12, %11, %cst {dimension_numbers = #tpu.dot_dimension_numbers<[1], [0], [0], [1], [0, 0, 1, 1], [], []>} : vector<8x32xf32>, vector<32x128xf32>, vector<8x128xf32> -> vector<8x128xf32>
      %c0_8 = arith.constant 0 : index
      %c0_9 = arith.constant 0 : index
      %14 = vector.load %arg3[%c0_8, %c0_9] : memref<8x32xf32, #tpu.memory_space<vmem>>, vector<8x32xf32>
      %cst_10 = arith.constant dense<0.000000e+00> : vector<8x128xf32>
      %15 = tpu.matmul %14, %11, %cst_10 {dimension_numbers = #tpu.dot_dimension_numbers<[1], [0], [0], [1], [0, 0, 1, 1], [], []>} : vector<8x32xf32>, vector<32x128xf32>, vector<8x128xf32> -> vector<8x128xf32>
      %16 = vector.shape_cast %13 : vector<8x128xf32> to vector<8x1x128xf32>
      %17 = vector.shape_cast %15 : vector<8x128xf32> to vector<1x8x128xf32>
      %18 = vector.broadcast %16 : vector<8x1x128xf32> to vector<8x8x128xf32>
      %19 = vector.broadcast %17 : vector<1x8x128xf32> to vector<8x8x128xf32>
      %20 = arith.subf %18, %19 : vector<8x8x128xf32>
      %21 = math.absf %20 : vector<8x8x128xf32>
      %22 = vector.shape_cast %21 : vector<8x8x128xf32> to vector<64x128xf32>
      %c0_11 = arith.constant 0 : index
      %c0_12 = arith.constant 0 : index
      %23 = vector.load %arg5[%c0_11, %c0_12] : memref<128x8xf32, #tpu.memory_space<vmem>>, vector<128x8xf32>
      %cst_13 = arith.constant dense<0.000000e+00> : vector<64x8xf32>
      %24 = tpu.matmul %22, %23, %cst_13 {dimension_numbers = #tpu.dot_dimension_numbers<[1], [0], [0], [1], [0, 0, 1, 1], [], []>} : vector<64x128xf32>, vector<128x8xf32>, vector<64x8xf32> -> vector<64x8xf32>
      %cst_14 = arith.constant 0.000000e+00 : f32
      %25 = vector.broadcast %cst_14 : f32 to vector<64x8xf32>
      %26 = arith.subf %25, %24 : vector<64x8xf32>
      %27 = math.exp %26 : vector<64x8xf32>
      %28 = vector.shape_cast %27 : vector<64x8xf32> to vector<8x8x8xf32>
      %c8_i32 = arith.constant 8 : i32
      %29 = arith.muli %arg0, %c8_i32 : i32
      %30 = tpu.assume_multiple %29, 8 : i32
      %31 = arith.index_cast %30 : i32 to index
      %c0_15 = arith.constant 0 : index
      %32 = vector.load %arg7[%31, %c0_15] : memref<8x8xf32, #tpu.memory_space<vmem>>, vector<8x8xf32>
      %cst_16 = arith.constant dense<0.000000e+00> : vector<8x8xf32>
      %33 = vector.multi_reduction <add>, %28, %cst_16 [1] : vector<8x8x8xf32> to vector<8x8xf32>
      %34 = arith.addf %32, %33 : vector<8x8xf32>
      %35 = arith.index_cast %30 : i32 to index
      %c0_17 = arith.constant 0 : index
      %36 = vector.load %arg7[%35, %c0_17] : memref<8x8xf32, #tpu.memory_space<vmem>>, vector<8x8xf32>
      tpu.vector_store %arg7[%35, %c0_17], %34 {strides = array<i32>} : memref<8x8xf32, #tpu.memory_space<vmem>>, vector<8x8xf32>,
      %37 = arith.cmpi sgt, %arg1, %arg0 : i32
      %38 = arith.extui %37 : i1 to i32
      %c0_i32_18 = arith.constant 0 : i32
      %39 = arith.cmpi ne, %38, %c0_i32_18 : i32
      scf.if %39 {
        %c8_i32_19 = arith.constant 8 : i32
        %40 = arith.muli %arg1, %c8_i32_19 : i32
        %41 = tpu.assume_multiple %40, 8 : i32
        %42 = arith.index_cast %41 : i32 to index
        %c0_20 = arith.constant 0 : index
        %43 = vector.load %arg7[%42, %c0_20] : memref<8x8xf32, #tpu.memory_space<vmem>>, vector<8x8xf32>
        %cst_21 = arith.constant dense<0.000000e+00> : vector<8x8xf32>
        %44 = vector.multi_reduction <add>, %28, %cst_21 [0] : vector<8x8x8xf32> to vector<8x8xf32>
        %45 = arith.addf %43, %44 : vector<8x8xf32>
        %46 = arith.index_cast %41 : i32 to index
        %c0_22 = arith.constant 0 : index
        %47 = vector.load %arg7[%46, %c0_22] : memref<8x8xf32, #tpu.memory_space<vmem>>, vector<8x8xf32>
        tpu.vector_store %arg7[%46, %c0_22], %45 {strides = array<i32>} : memref<8x8xf32, #tpu.memory_space<vmem>>, vector<8x8xf32>,
      } else {
      }
    } else {
    }
    %c0_i32_3 = arith.constant 0 : i32
    %8 = arith.cmpi eq, %arg1, %c0_i32_3 : i32
    %9 = arith.extui %8 : i1 to i32
    %c0_i32_4 = arith.constant 0 : i32
    %10 = arith.cmpi ne, %9, %c0_i32_4 : i32
    scf.if %10 {
      %c8_i32 = arith.constant 8 : i32
      %11 = arith.muli %arg0, %c8_i32 : i32
      %12 = tpu.assume_multiple %11, 8 : i32
      %c0 = arith.constant 0 : index
      %c0_5 = arith.constant 0 : index
      %13 = vector.load %arg2[%c0, %c0_5] : memref<8x32xf32, #tpu.memory_space<vmem>>, vector<8x32xf32>
      %c0_6 = arith.constant 0 : index
      %c0_7 = arith.constant 0 : index
      %14 = vector.load %arg6[%c0_6, %c0_7] : memref<8x40xf32, #tpu.memory_space<vmem>>, vector<8x32xf32>
      tpu.vector_store %arg6[%c0_6, %c0_7], %13 {strides = array<i32>} : memref<8x40xf32, #tpu.memory_space<vmem>>, vector<8x32xf32>,
      %15 = arith.index_cast %12 : i32 to index
      %c0_8 = arith.constant 0 : index
      %16 = vector.load %arg7[%15, %c0_8] : memref<8x8xf32, #tpu.memory_space<vmem>>, vector<8x8xf32>
      %cst = arith.constant 1.000000e+00 : f32
      %17 = vector.broadcast %cst : f32 to vector<8x8xf32>
      %18 = arith.subf %16, %17 : vector<8x8xf32>
      %c0_9 = arith.constant 0 : index
      %c32 = arith.constant 32 : index
      %19 = vector.load %arg6[%c0_9, %c32] : memref<8x40xf32, #tpu.memory_space<vmem>>, vector<8x8xf32>
      tpu.vector_store %arg6[%c0_9, %c32], %18 {strides = array<i32>} : memref<8x40xf32, #tpu.memory_space<vmem>>, vector<8x8xf32>,
    } else {
    }
    return
  }
  func.func @transform_0(%arg0: i32, %arg1: i32) -> (i32, i32) {
    %c0_i32 = arith.constant 0 : i32
    %c0_i32_0 = arith.constant 0 : i32
    return %arg0, %c0_i32 : i32, i32
  }
  func.func @transform_1(%arg0: i32, %arg1: i32) -> (i32, i32) {
    %c0_i32 = arith.constant 0 : i32
    %c0_i32_0 = arith.constant 0 : i32
    return %arg1, %c0_i32 : i32, i32
  }
  func.func @transform_2(%arg0: i32, %arg1: i32) -> (i32, i32) {
    %c0_i32 = arith.constant 0 : i32
    %c0_i32_0 = arith.constant 0 : i32
    %c0_i32_1 = arith.constant 0 : i32
    return %c0_i32, %c0_i32_0 : i32, i32
  }
  func.func @transform_3(%arg0: i32, %arg1: i32) -> (i32, i32) {
    %c0_i32 = arith.constant 0 : i32
    %c0_i32_0 = arith.constant 0 : i32
    %c0_i32_1 = arith.constant 0 : i32
    return %c0_i32, %c0_i32_0 : i32, i32
  }
  func.func @transform_4(%arg0: i32, %arg1: i32) -> (i32, i32) {
    %c0_i32 = arith.constant 0 : i32
    %c0_i32_0 = arith.constant 0 : i32
    return %arg0, %c0_i32 : i32, i32
  }
}

</mosaic_0001>

<bundles_post_ra>
// kernel: tpu_custom_call.1
= control target key start
LH: loop header
LB: loop body
LE: loop exit
PB: predicated region body
PF: predicated region fallthrough
CT: control target
= control target key end

     0   :  { %v711_v1 = vmov 0.0   ;;  %vm712_vm0 = vmmov 0   ;;  %vm35_vm1 = vcmask 261120   ;;  %s836_s0 = inlined_call_operand.vmem [shape: f32[8,32], index: 0, kind: input, shape index: {}]   ;;  %s837_s1 = inlined_call_operand.vmem [shape: f32[8,32], index: 1, kind: input, shape index: {}]   ;;  %s838_s2 = inlined_call_operand.vmem [shape: f32[32,128], index: 2, kind: input, shape index: {}]   ;;  %s839_s3 = inlined_call_operand.vmem [shape: f32[128,8], index: 3, kind: input, shape index: {}]   ;;  %s840_s4 = inlined_call_operand.hbm [shape: f32[8,40], index: 4, kind: output, shape index: {}]  }
   0x1   :  { %v33_v0 = vld [vmem:[%s838_s2 + $0x18] sm:$0xff]  ;;  %602 = vmatprep.subr.mxu1 %v711_v1  ;;  %v32_v2 = vld [vmem:[%s838_s2 + $0x10] sm:$0xff]  ;;  %610 = vmatprep.mubr.msk.f32.mxu1 %vm712_vm0, %v711_v1  ;;  %v34_v3 = vld [vmem:[%s836_s0] sm:$0xff] }
   0x2   :  { %603 = vmatpush3.msra.mxu1 %v33_v0  ;;  %v304_v4 = vld [vmem:[%s839_s3 + $0x78] sm:$0xff]  ;;  %v303_v5 = vld [vmem:[%s839_s3 + $0x70] sm:$0xff]  ;;  %541 = vst.msk [vmem:[#allocation3] sm:$0xff] %vm35_vm1, %v34_v3  ;;  %v31_v6 = vld [vmem:[%s838_s2 + $0x8] sm:$0xff] }
   0x3   :  { %604 = vmatprep.subr.mxu1 %v711_v1  ;;  %624 = vmatprep.subr.mxu0 %v304_v4  ;;  %v302_v7 = vld [vmem:[%s839_s3 + $0x68] sm:$0xff]  ;;  %v30_v8 = vld [vmem:[%s838_s2] sm:$0xff] }
   0x4   :  { %605 = vmatpush3.msra.mxu1 %v32_v2  ;;  %625 = vmatpush3.msra.mxu0 %v304_v4 }
   0x5   :  { %606 = vmatprep.subr.mxu1 %v711_v1  ;;  %626 = vmatprep.subr.mxu0 %v303_v5 }
   0x6   :  { %9 = vsyncpa [#allocation4], 0  ;;  %607 = vmatpush3.msra.mxu1 %v31_v6  ;;  %627 = vmatpush3.msra.mxu0 %v303_v5  ;;  %v301_v9 = vld [vmem:[%s839_s3 + $0x60] sm:$0xff]  ;;  %v300_v10 = vld [vmem:[%s839_s3 + $0x58] sm:$0xff]  ;;  %vm24_vm2 = vcmask 64512   ;;  %v188_v25 = vlaneseq  ;;  %vm502_vm3 = vcmask 1041409  }
   0x7   :  { %608 = vmatprep.subr.mxu1 %v711_v1  ;;  %628 = vmatprep.subr.mxu0 %v302_v7  ;;  %v299_v11 = vld [vmem:[%s839_s3 + $0x50] sm:$0xff]  ;;  %v109_v12 = vld [vmem:[%s837_s1] sm:$0xff]  ;;  %v298_v13 = vld [vmem:[%s839_s3 + $0x48] sm:$0xff]  ;;  %25 = vst.msk [vmem:[#allocation2] sm:$0xff] %vm24_vm2, %v711_v1  ;;  %v713_v23 = vmov 1966171168  }
   0x8   :  { %609 = vmatpush3.msra.mxu1 %v30_v8  ;;  %629 = vmatpush3.msra.mxu0 %v302_v7  ;;  %v297_v14 = vld [vmem:[%s839_s3 + $0x40] sm:$0xff]  ;;  %v296_v15 = vld [vmem:[%s839_s3 + $0x38] sm:$0xff]  ;;  %v295_v16 = vld [vmem:[%s839_s3 + $0x30] sm:$0xff]  ;;  %v186_v24 = vunpack.c.l.s4 %v713_v23  ;;  %v189_v27 = vshrl.u32 %v188_v25, 7  ;;  %vm504_vm4 = vcmask 1042434   ;;  %vm506_vm5 = vcmask 1043459  }
   0x9   :  { %611 = vmatmul.mubr.msk.f32.vlgmr.msra.gmra.mxu1 %vm35_vm1, %v34_v3  ;;  %613 = vmatprep.subr.mxu1 %v711_v1  ;;  %v294_v17 = vld [vmem:[%s839_s3 + $0x28] sm:$0xff]  ;;  %v293_v18 = vld [vmem:[%s839_s3 + $0x20] sm:$0xff]  ;;  %v292_v19 = vld [vmem:[%s839_s3 + $0x18] sm:$0xff]  ;;  %vm508_vm6 = vcmask 1044484   ;;  %vm510_vm7 = vcmask 1045509   ;;  %vm512_vm8 = vcmask 1046534  }
   0xa   :  { %614 = vmatpush3.msra.mxu1 %v33_v0  ;;  %621 = vmatprep.mubr.msk.f32.mxu1 %vm712_vm0, %v711_v1  ;;  %v291_v20 = vld [vmem:[%s839_s3 + $0x10] sm:$0xff]  ;;  %v290_v21 = vld [vmem:[%s839_s3 + $0x8] sm:$0xff]  ;;  %v289_v22 = vld [vmem:[%s839_s3] sm:$0xff]  ;;  %v187_v26 = vunpack.c.0.s8 %v186_v24  ;;  %v235_v32 = vsub.s32 0, %v189_v27  ;;  %vm514_vm9 = vcmask 1047559   ;;  %s714_s3 = smov 32  }
   0xb   :  { %615 = vmatprep.subr.mxu1 %v711_v1  ;;  %630 = vmatprep.subr.mxu0 %v301_v9  ;;  %s715_s29 = smov [#allocation3]   ;;  %vm549_vm10 = vcmask 326912  }
   0xc   :  { %616 = vmatpush3.msra.mxu1 %v32_v2  ;;  %631 = vmatpush3.msra.mxu0 %v301_v9  ;;  %v190_v28 = vsub.s32 %v187_v26, %v189_v27  ;;  %s557_s30 = sshll.u32 %s715_s29, 4  ;;  %s558_s30 = int_to_ptr.vmem [resolvable:$true] %s557_s30 }
   0xd   :  { %617 = vmatprep.subr.mxu1 %v711_v1  ;;  %632 = vmatprep.subr.mxu0 %v300_v10  ;;  %s689_s5 = scalar_lea.vmem %s558_s30, 128  ;;  %p694_p1 = scmp.lt.s32.totalorder %s558_s30, %s558_s30 }
   0xe   :  { %618 = vmatpush3.msra.mxu1 %v31_v6  ;;  %633 = vmatpush3.msra.mxu0 %v300_v10  ;;  %p690_p0 = scmp.ne.s32.totalorder %s558_s30, %s689_s5  ;;  %p695_p2 = scmp.lt.s32.totalorder %s689_s5, %s689_s5 }
   0xf   :  { %619 = vmatprep.subr.mxu1 %v711_v1  ;;  %634 = vmatprep.subr.mxu0 %v299_v11 }
  0x10   :  { %620 = vmatpush3.msra.mxu1 %v30_v8  ;;  %635 = vmatpush3.msra.mxu0 %v299_v11  ;;  %p696_p3 = por %p695_p2, %p694_p1 }
  0x11   :  { %622 = vmatmul.mubr.msk.f32.vlgmr.msra.gmra.mxu1 %vm35_vm1, %v109_v12  ;;  %636 = vmatprep.subr.mxu0 %v298_v13 }
  0x12   :  { %637 = vmatpush3.msra.mxu0 %v298_v13  ;;  %p697_p4 = pnand %p696_p3, %p690_p0 }
  0x13   :  { %638 = vmatprep.subr.mxu0 %v297_v14 }
  0x14   :  { %639 = vmatpush3.msra.mxu0 %v297_v14 }
  0x15   :  { %640 = vmatprep.subr.mxu0 %v296_v15 }
  0x16   :  { %641 = vmatpush3.msra.mxu0 %v296_v15 }
  0x17   :  { %642 = vmatprep.subr.mxu0 %v295_v16 }
  0x18   :  { %643 = vmatpush3.msra.mxu0 %v295_v16 }
  0x19   :  { %644 = vmatprep.subr.mxu0 %v294_v17 }
  0x1a   :  { %645 = vmatpush3.msra.mxu0 %v294_v17 }
  0x1b   :  { %646 = vmatprep.subr.mxu0 %v293_v18 }
  0x1c   :  { %647 = vmatpush3.msra.mxu0 %v293_v18 }
  0x1d   :  { %648 = vmatprep.subr.mxu0 %v292_v19 }
  0x1e   :  { %649 = vmatpush3.msra.mxu0 %v292_v19 }
  0x1f   :  { %650 = vmatprep.subr.mxu0 %v291_v20 }
  0x20   :  { %651 = vmatpush3.msra.mxu0 %v291_v20 }
  0x21   :  { %652 = vmatprep.subr.mxu0 %v290_v21 }
  0x22   :  { %653 = vmatpush3.msra.mxu0 %v290_v21 }
  0x23   :  { %654 = vmatprep.subr.mxu0 %v289_v22 }
  0x24   :  { %655 = vmatpush3.msra.mxu0 %v289_v22 }
  0xc9   :  { %v105_v29 = vpop.f32.mrf.mxu1 }
  0xca   :  { %v184_v30 = vcombine.high %v105_v29, %v105_v29  ;;  %v191_v31 = vrot.slane %v105_v29, %v190_v28 }
  0xcb   :  { %v612_v33 = vpop.f32.mrf.mxu1 }
  0xcc   :  { %v198_v34 = vrot.slane %v184_v30, %v190_v28  ;;  %v199_v35 = vcombine.high %v191_v31, %v191_v31  ;;  %v207_v36 = vrot.slane %v191_v31, %v190_v28 }
  0xce   :  { %v200_v37 = vcombine.high %v198_v34, %v198_v34  ;;  %v214_v38 = vrot.slane %v198_v34, %v190_v28  ;;  %v221_v39 = vrot.slane %v199_v35, %v190_v28  ;;  %v229_v40 = vcombine.high %v207_v36, %v207_v36 }
  0xcf   :  { %v236_v41 = vrot.slane %v207_v36, %v235_v32 }
  0xd0   :  { %v231_v42 = vcombine.high %v221_v39, %v221_v39  ;;  %v240_v43 = vrot.slane %v221_v39, %v235_v32  ;;  %v228_v44 = vrot.slane %v200_v37, %v190_v28  ;;  %v230_v45 = vcombine.high %v214_v38, %v214_v38 }
  0xd1   :  { %v179_v46 = vpop.f32.mrf.mxu1  ;;  %v244_v47 = vrot.slane %v229_v40, %v235_v32  ;;  %v252_v51 = vrot.slane %v214_v38, %v235_v32 }
  0xd2   :  { %v273_v48 = vsub.f32 %v236_v41, %v179_v46  ;;  %v274_v49 = vsub.f32 %v240_v43, %v179_v46  ;;  %v248_v50 = vrot.slane %v231_v42, %v235_v32  ;;  %v256_v57 = vrot.slane %v228_v44, %v235_v32 }
  0xd3   :  { %v623_v52 = vpop.f32.mrf.mxu1  ;;  %v275_v53 = vsub.f32 %v244_v47, %v179_v46  ;;  %v232_v58 = vcombine.high %v228_v44, %v228_v44  ;;  %v277_v60 = vsub.f32 %v252_v51, %v179_v46  ;;  %v260_v61 = vrot.slane %v230_v45, %v235_v32 }
  0xd4   :  { %v281_v54 = vand.u32 2147483647, %v273_v48  ;;  %v282_v55 = vand.u32 2147483647, %v274_v49  ;;  %v276_v56 = vsub.f32 %v248_v50, %v179_v46  ;;  %v278_v63 = vsub.f32 %v256_v57, %v179_v46 }
  0xd5   :  { %v283_v59 = vand.u32 2147483647, %v275_v53  ;;  %v264_v0 = vrot.slane %v232_v58, %v235_v32  ;;  %v285_v1 = vand.u32 2147483647, %v277_v60  ;;  %v279_v2 = vsub.f32 %v260_v61, %v179_v46 }
  0xd6   :  { %656 = vmatprep.mubr.f32.mxu0 %v281_v54  ;;  %v284_v62 = vand.u32 2147483647, %v276_v56  ;;  %v286_v3 = vand.u32 2147483647, %v278_v63 }
  0xd7   :  { %657 = vmatmul.mubr.f32.vlgmr.msra.gmra.mxu0 %v282_v55  ;;  %v280_v4 = vsub.f32 %v264_v0, %v179_v46  ;;  %v287_v5 = vand.u32 2147483647, %v279_v2 }
  0xd8   :  { %659 = vmatprep.mubr.f32.mxu0 %v283_v59 }
  0xd9   :  { %v288_v6 = vand.u32 2147483647, %v280_v4 }
  0xdb   :  { %660 = vmatmul.mubr.f32.gmra.mxu0 %v284_v62 }
  0xdc   :  { %662 = vmatprep.mubr.f32.mxu0 %v285_v1 }
  0xdf   :  { %663 = vmatmul.mubr.f32.gmra.mxu0 %v286_v3 }
  0xe0   :  { %665 = vmatprep.mubr.f32.mxu0 %v287_v5 }
  0xe3   :  { %666 = vmatmul.mubr.f32.gmra.mxu0 %v288_v6 }
 0x197   :  { %v658_v7 = vpop.f32.mrf.mxu0 }
 0x198   :  { %v411_v8 = vsub.f32 0.0, %v658_v7 }
 0x199   :  { %v371_v9 = vpop.f32.mrf.mxu0 }
 0x19a   :  { %v420_v10 = vmul.f32 1.442695, %v411_v8  ;;  %v410_v11 = vsub.f32 0.0, %v371_v9 }
 0x19b   :  { %v661_v12 = vpop.f32.mrf.mxu0 }
 0x19c   :  { %673 = vpow2.f32 %v420_v10  ;;  %v418_v13 = vmul.f32 1.442695, %v410_v11  ;;  %v413_v14 = vsub.f32 0.0, %v661_v12 }
 0x19d   :  { %v381_v15 = vpop.f32.mrf.mxu0 }
 0x19e   :  { %675 = vpow2.f32 %v418_v13  ;;  %v424_v16 = vmul.f32 1.442695, %v413_v14  ;;  %v412_v17 = vsub.f32 0.0, %v381_v15 }
 0x19f   :  { %v664_v18 = vpop.f32.mrf.mxu0 }
 0x1a0   :  { %677 = vpow2.f32 %v424_v16  ;;  %v422_v19 = vmul.f32 1.442695, %v412_v17  ;;  %v415_v20 = vsub.f32 0.0, %v664_v18 }
 0x1a1   :  { %v391_v21 = vpop.f32.mrf.mxu0 }
 0x1a2   :  { %679 = vpow2.f32 %v422_v19  ;;  %v428_v22 = vmul.f32 1.442695, %v415_v20  ;;  %v414_v23 = vsub.f32 0.0, %v391_v21 }
 0x1a3   :  { %v667_v24 = vpop.f32.mrf.mxu0 }
 0x1a4   :  { %681 = vpow2.f32 %v428_v22  ;;  %v426_v25 = vmul.f32 1.442695, %v414_v23  ;;  %v417_v26 = vsub.f32 0.0, %v667_v24 }
 0x1a5   :  { %v401_v27 = vpop.f32.mrf.mxu0 }
 0x1a6   :  { %683 = vpow2.f32 %v426_v25  ;;  %v432_v28 = vmul.f32 1.442695, %v417_v26  ;;  %v416_v29 = vsub.f32 0.0, %v401_v27 }
 0x1a8   :  { %685 = vpow2.f32 %v432_v28  ;;  %v430_v30 = vmul.f32 1.442695, %v416_v29 }
 0x1a9   :  { %v674_v31 = vpop.eup %673 }
 0x1aa   :  { %v445_v32 = vsel %vm24_vm2, %v674_v31, 0.0  ;;  %687 = vpow2.f32 %v430_v30 }
 0x1ab   :  { %v676_v33 = vpop.eup %675  ;;  %v446_v34 = vrot.slane %v445_v32, 4 }
 0x1ac   :  { %v438_v35 = vsel %vm24_vm2, %v676_v33, 0.0 }
 0x1ad   :  { %v678_v36 = vpop.eup %677  ;;  %v447_v37 = vadd.f32 %v446_v34, %v445_v32  ;;  %v439_v38 = vrot.slane %v438_v35, 4 }
 0x1ae   :  { %v459_v39 = vsel %vm24_vm2, %v678_v36, 0.0 }
 0x1af   :  { %v680_v40 = vpop.eup %679  ;;  %v448_v41 = vrot.slane %v447_v37, 2  ;;  %v440_v42 = vadd.f32 %v439_v38, %v438_v35  ;;  %v460_v43 = vrot.slane %v459_v39, 4  ;;  %v436_v35 = vld [vmem:[#allocation2] sm:$0xff] }
 0x1b0   :  { %v452_v44 = vsel %vm24_vm2, %v680_v40, 0.0 }
 0x1b1   :  { %v682_v45 = vpop.eup %681  ;;  %v441_v46 = vrot.slane %v440_v42, 2  ;;  %v461_v47 = vadd.f32 %v460_v43, %v459_v39  ;;  %v453_v48 = vrot.slane %v452_v44, 4  ;;  %v449_v49 = vadd.f32 %v448_v41, %v447_v37 }
 0x1b2   :  { %v473_v50 = vsel %vm24_vm2, %v682_v45, 0.0 }
 0x1b3   :  { %v684_v51 = vpop.eup %683  ;;  %v442_v52 = vadd.f32 %v441_v46, %v440_v42  ;;  %v462_v53 = vrot.slane %v461_v47, 2  ;;  %v454_v54 = vadd.f32 %v453_v48, %v452_v44  ;;  %v474_v55 = vrot.slane %v473_v50, 4 }
 0x1b4   :  { %v466_v56 = vsel %vm24_vm2, %v684_v51, 0.0  ;;  %v450_v60 = vrot.slane %v449_v49, 1 }
 0x1b5   :  { %v686_v57 = vpop.eup %685  ;;  %v443_v58 = vrot.slane %v442_v52, 1  ;;  %v455_v59 = vrot.slane %v454_v54, 2  ;;  %v475_v61 = vadd.f32 %v474_v55, %v473_v50  ;;  %v467_v62 = vrot.slane %v466_v56, 4 }
 0x1b6   :  { %v487_v63 = vsel %vm24_vm2, %v686_v57, 0.0  ;;  %v463_v1 = vadd.f32 %v462_v53, %v461_v47  ;;  %v451_v10 = vadd.f32 %v450_v60, %v449_v49 }
 0x1b7   :  { %v688_v0 = vpop.eup %687  ;;  %v456_v2 = vadd.f32 %v455_v59, %v454_v54  ;;  %v488_v3 = vrot.slane %v487_v63, 4  ;;  %v476_v4 = vrot.slane %v475_v61, 2  ;;  %v468_v5 = vadd.f32 %v467_v62, %v466_v56 }
 0x1b8   :  { %v480_v6 = vsel %vm24_vm2, %v688_v0, 0.0  ;;  %v444_v7 = vadd.f32 %v443_v58, %v442_v52  ;;  %v464_v13 = vrot.slane %v463_v1, 1 }
 0x1b9   :  { %v457_v8 = vrot.slane %v456_v2, 1  ;;  %v489_v9 = vadd.f32 %v488_v3, %v487_v63  ;;  %v469_v11 = vrot.slane %v468_v5, 2  ;;  %v481_v12 = vrot.slane %v480_v6, 4 }
 0x1ba   :  { %v477_v15 = vadd.f32 %v476_v4, %v475_v61  ;;  %v503_v19 = vsel %vm502_vm3, %v451_v10, %v444_v7  ;;  %v465_v24 = vadd.f32 %v464_v13, %v463_v1 }
 0x1bb   :  { %v458_v14 = vadd.f32 %v457_v8, %v456_v2  ;;  %v490_v16 = vrot.slane %v489_v9, 2  ;;  %v470_v17 = vadd.f32 %v469_v11, %v468_v5  ;;  %v482_v18 = vadd.f32 %v481_v12, %v480_v6 }
 0x1bc   :  { %v478_v25 = vrot.slane %v477_v15, 1 }
 0x1bd   :  { %v491_v20 = vadd.f32 %v490_v16, %v489_v9  ;;  %v505_v21 = vsel %vm504_vm4, %v458_v14, %v503_v19  ;;  %v471_v22 = vrot.slane %v470_v17, 1  ;;  %v483_v23 = vrot.slane %v482_v18, 2 }
 0x1be   :  { %v507_v28 = vsel %vm506_vm5, %v465_v24, %v505_v21  ;;  %v479_v32 = vadd.f32 %v478_v25, %v477_v15 }
 0x1bf   :  { %v472_v26 = vadd.f32 %v471_v22, %v470_v17  ;;  %v484_v27 = vadd.f32 %v483_v23, %v482_v18  ;;  %v492_v29 = vrot.slane %v491_v20, 1 }
 0x1c1   :  { %v509_v30 = vsel %vm508_vm6, %v472_v26, %v507_v28  ;;  %v485_v31 = vrot.slane %v484_v27, 1  ;;  %v493_v34 = vadd.f32 %v492_v29, %v491_v20 }
 0x1c2   :  { %v511_v36 = vsel %vm510_vm7, %v479_v32, %v509_v30 }
 0x1c3   :  { %v486_v33 = vadd.f32 %v485_v31, %v484_v27 }
 0x1c5   :  { %v513_v37 = vsel %vm512_vm8, %v486_v33, %v511_v36 }
 0x1c6   :  { %v515_v38 = vsel %vm514_vm9, %v493_v34, %v513_v37 }
 0x1c7   :  { %v517_v39 = vadd.f32 %v515_v38, %v436_v35 }
 0x1c9   :  { %518 = vst.msk [vmem:[#allocation2] sm:$0xff] %vm24_vm2, %v517_v39 }
 0x1d0   :  { %v543_v40 = vld [vmem:[#allocation2] sm:$0xff] }
 0x1d1   :  { %v567_v41 = vadd.f32 -1.0, %v543_v40 }
 0x1d3   :  { %546 = vrot.lane.b32.xlu0 %v567_v41, %s714_s3 }
 0x245   :  { %v547_v42 = vpop.permute.xlu0 %546 }
 0x246   :  { %550 = vst.msk [vmem:[#allocation3] sm:$0xff] %vm549_vm10, %v547_v42 }
 0x247   :  { %700 = shalt.err (!%p697_p4)
}
 0x248   :  { %560 = dma.vmem_to_hbm [thread:$0]  %s558_s30, 128, %s840_s4, [#allocation4]  }
 0x249   :  { %709 = dma.done.wait [#allocation4], 128  }
 0x24a   :  { %710 = vsyncadd [#allocation4], 4294967168 }
 0x24b   :  { %564 = vsyncpa [#allocation4], 1 }

</bundles_post_ra>
